<compile_context>
chip_gen: v5e
topology: v5e:2x2
jax: 0.10.0
libtpu: 0.0.40
codegen_flags: <defaults>
</compile_context>

<pallas_src>
import math

import jax
import jax.numpy as jnp
from jax.experimental import pallas as pl
from jax.experimental.pallas import tpu as pltpu


# ---------------------------------------------------------------------------
# Kernels
# ---------------------------------------------------------------------------
def _wl_bias_kernel(x_ref, w_ref, b_ref, o_ref):
    # x_ref: (T, gD) compute dtype, w_ref: (1, gD, gO) compute dtype,
    # b_ref: (1, gO) f32, o_ref: (T, gO) output dtype.
    acc = jnp.dot(x_ref[...], w_ref[0], preferred_element_type=jnp.float32)
    o_ref[...] = (acc + b_ref[...]).astype(o_ref.dtype)


def _wl_nobias_kernel(x_ref, w_ref, o_ref):
    o_ref[...] = jnp.dot(
        x_ref[...], w_ref[0], preferred_element_type=jnp.float32
    ).astype(o_ref.dtype)


# ---------------------------------------------------------------------------
# Hardware-aware helpers
# ---------------------------------------------------------------------------
def _vmem_limit_bytes():
    """Generation-aware scoped-VMEM limit (48 MiB on v5e/v6e, 32 MiB on v7x)."""
    try:
        cap = int(pltpu.get_tpu_info().vmem_capacity_bytes)
    except Exception:
        cap = 64 * 1024 * 1024  # conservative: assume v7x-sized VMEM
    if cap >= 96 * 1024 * 1024:   # v5e / v6e: 128 MiB per TensorCore
        return 48 * 1024 * 1024
    return 32 * 1024 * 1024       # v7x: 64 MiB per TensorCore


def _is_v5e():
    try:
        kind = jax.devices()[0].device_kind.lower()
    except Exception:
        return False
    return ("v5 lite" in kind) or ("v5e" in kind) or ("v5litepod" in kind)


_SINGLE_BUFFER_OK = None


def _single_buffer_supported():
    """One-time probe: does this JAX build accept pipeline_mode=pl.Buffered(1)?"""
    global _SINGLE_BUFFER_OK
    if _SINGLE_BUFFER_OK is None:
        def _probe(x_ref, o_ref):
            o_ref[...] = x_ref[...]
        try:
            out = pl.pallas_call(
                _probe,
                out_shape=jax.ShapeDtypeStruct((8, 128), jnp.float32),
                grid=(1,),
                in_specs=[pl.BlockSpec((8, 128), lambda i: (0, 0),
                                       pipeline_mode=pl.Buffered(1))],
                out_specs=pl.BlockSpec((8, 128), lambda i: (0, 0)),
            )(jnp.zeros((8, 128), jnp.float32))
            jax.block_until_ready(out)
            _SINGLE_BUFFER_OK = True
        except Exception:
            _SINGLE_BUFFER_OK = False
    return _SINGLE_BUFFER_OK


def _pick_tile_bl(BL, per_row_bytes, budget_bytes, row_align):
    """Largest row tile (multiple of row_align, <= 4096) fitting the budget."""
    if BL <= row_align:
        return BL
    t = budget_bytes // max(per_row_bytes, 1)
    t = (t // row_align) * row_align
    t = max(row_align, min(4096, t))
    return BL if BL <= t else t


def _choose_group_size(N, D, O, w_itemsize, weight_budget_bytes, allow_full_fold):
    """Heads folded per block: N (full fold) or smallest lane-dense divisor."""
    if allow_full_fold and (N * D) * (N * O) * w_itemsize <= weight_budget_bytes:
        return N
    for g in range(1, N):
        if N % g == 0 and (g * D) % 128 == 0 and (g * O) % 128 == 0:
            return g
    # TODO(synk): for huge folded weights with no lane-dense sub-fold, split the
    # reduction (K) axis over a third grid dimension instead of folding all N.
    return N


# ---------------------------------------------------------------------------
# Wrapper
# ---------------------------------------------------------------------------
def weighted_linear(x, weight, bias, *, num_heads, head_size, out_features,
                    compute_dtype=jnp.bfloat16, group_size=None):
    """x: (B, L, N, D); weight: (O, N*D); bias: (O,) or None -> (B, L, N, O)."""
    B, L, N, D = x.shape
    assert N == num_heads and D == head_size
    O = out_features
    BL = B * L

    out_dtype = x.dtype
    c_dtype = jnp.dtype(compute_dtype)
    c_itemsize = c_dtype.itemsize
    out_itemsize = jnp.dtype(out_dtype).itemsize

    vmem_limit = _vmem_limit_bytes()
    weight_budget = vmem_limit // 4

    if group_size is None:
        # v5e: folding all N heads inflates MXU FLOPs by N; stay mem-bound by
        # requiring the folded intensity (~N*D*O/(D+O) FLOP/byte) to sit under
        # the bf16 compute roofline (~250 FLOP/byte on v5e). v6e/v7x have a far
        # higher FLOP/byte ratio and stay mem-bound for realistic N.
        intensity = N * D * O / float(D + O)
        allow_full = (not _is_v5e()) or intensity <= 220.0
        g = _choose_group_size(N, D, O, c_itemsize, weight_budget, allow_full)
    else:
        assert N % group_size == 0, "group_size must divide num_heads"
        g = group_size
    G = N // g
    gD, gO = g * D, g * O

    # --- operands: flat, lane-dense layouts (reshapes are free) -------------
    x2 = x.reshape(BL, N * D).astype(c_dtype)
    # TODO(synk): in a full model, produce the activation directly in bf16 (or
    # let XLA fuse this cast into its producer) so the cast pass disappears.

    # Per-group block-diagonal weight (exact zeros), built once from the small
    # (O, N*D) parameter:  w_g[grp, a*D+d, b*O+o] = weight[o, grp*g+a, d]·[a==b]
    w_h = jnp.transpose(weight.reshape(O, N, D), (1, 2, 0)).astype(c_dtype)  # (N,D,O)
    eye_g = jnp.eye(g, dtype=c_dtype)
    w_g = (w_h.reshape(G, g, D, O)[:, :, :, None, :]
           * eye_g[None, :, None, :, None]).reshape(G, gD, gO)

    # --- VMEM budgeting ------------------------------------------------------
    single_buffer = (G == 1) and _single_buffer_supported()
    w_bufs = 1 if single_buffer else 2
    resident = w_bufs * gD * gO * c_itemsize
    if bias is not None:
        resident += w_bufs * gO * 4  # f32 bias row

    row_align = max(8, 32 // c_itemsize)                 # 8 for f32, 16 for bf16
    per_row = 2 * (gD * c_itemsize + gO * out_itemsize)  # double-buffered in/out
    tile_budget = max(vmem_limit - resident - 2 * 1024 * 1024, 2 * 1024 * 1024)
    tile_bl = _pick_tile_bl(BL, per_row, tile_budget, row_align)

    grid = (G, pl.cdiv(BL, tile_bl))

    # --- specs ---------------------------------------------------------------
    if single_buffer:
        w_spec = pl.BlockSpec((1, gD, gO), lambda h, i: (h, 0, 0),
                              pipeline_mode=pl.Buffered(1))
        b_spec = pl.BlockSpec((1, gO), lambda h, i: (0, 0),
                              pipeline_mode=pl.Buffered(1))
    else:
        w_spec = pl.BlockSpec((1, gD, gO), lambda h, i: (h, 0, 0))
        b_spec = pl.BlockSpec((1, gO), lambda h, i: (0, 0))

    in_specs = [pl.BlockSpec((tile_bl, gD), lambda h, i: (i, h)), w_spec]
    operands = [x2, w_g]
    if bias is None:
        kernel = _wl_nobias_kernel
    else:
        kernel = _wl_bias_kernel
        in_specs.append(b_spec)
        operands.append(jnp.tile(bias.astype(jnp.float32), g).reshape(1, gO))

    out2 = pl.pallas_call(
        kernel,
        out_shape=jax.ShapeDtypeStruct((BL, N * O), out_dtype),
        grid_spec=pltpu.PrefetchScalarGridSpec(
            num_scalar_prefetch=0,
            grid=grid,
            in_specs=in_specs,
            out_specs=pl.BlockSpec((tile_bl, gO), lambda h, i: (i, h)),
        ),
        compiler_params=pltpu.CompilerParams(
            # TODO(synk): on v7x verify the BL axis is sharded across both
            # TensorCores; switch this axis to pltpu.CORE_PARALLEL if one TC idles.
            dimension_semantics=("parallel", "parallel"),
            vmem_limit_bytes=vmem_limit,
        ),
    )(*operands)

    # Free reshape back: column n*O + o  <->  (head n, out-feature o).
    return out2.reshape(B, L, N, O)


if __name__ == "__main__":
    # Small shapes consistent with the module's forward (input.dim() == 4).
    B, L = 2, 8
    num_heads, head_size, out_features = 4, 64, 64

    key = jax.random.PRNGKey(0)
    k_x, k_w, k_b = jax.random.split(key, 3)

    x = jax.random.normal(k_x, (B, L, num_heads, head_size), dtype=jnp.float32)

    # PyTorch-like init: kaiming_uniform_(a=sqrt(5)) on (O, N*D) gives
    # U(-1/sqrt(fan_in), 1/sqrt(fan_in)) with fan_in = N*D; same bound for bias.
    fan_in = num_heads * head_size
    bound = 1.0 / math.sqrt(fan_in)
    weight = jax.random.uniform(
        k_w, (out_features, num_heads * head_size),
        minval=-bound, maxval=bound, dtype=jnp.float32)
    bias = jax.random.uniform(
        k_b, (out_features,), minval=-bound, maxval=bound, dtype=jnp.float32)

    # References: full-f32 einsum and bf16-quantized-input einsum (f32 accumulate).
    w3 = weight.reshape(out_features, num_heads, head_size)
    ref_f32 = jnp.einsum('blnd,ond->blno', x, w3)
    ref_bf16 = jnp.einsum(
        'blnd,ond->blno',
        x.astype(jnp.bfloat16).astype(jnp.float32),
        w3.astype(jnp.bfloat16).astype(jnp.float32))

    # 1) Default path: bf16 compute, full block-diagonal fold, with bias.
    out = weighted_linear(
        x, weight, bias,
        num_heads=num_heads, head_size=head_size, out_features=out_features)
    out = jax.block_until_ready(out)
    assert out.shape == (B, L, num_heads, out_features)
    assert jnp.allclose(out, ref_bf16 + bias, atol=1e-3, rtol=1e-3)
    assert jnp.allclose(out, ref_f32 + bias, atol=5e-2, rtol=5e-2)

    # 2) bf16, no bias (bias=False module config).
    out_nb = weighted_linear(
        x, weight, None,
        num_heads=num_heads, head_size=head_size, out_features=out_features)
    out_nb = jax.block_until_ready(out_nb)
    assert jnp.allclose(out_nb, ref_bf16, atol=1e-3, rtol=1e-3)

    # 3) Grouped per-head path (2 heads per block -> 128-lane tiles), bf16.
    out_g = weighted_linear(
        x, weight, bias,
        num_heads=num_heads, head_size=head_size, out_features=out_features,
        group_size=2)
    out_g = jax.block_until_ready(out_g)
    assert jnp.allclose(out_g, ref_bf16 + bias, atol=1e-3, rtol=1e-3)

    # 4) Exact f32 compute path matches the f32 reference tightly.
    out_f = weighted_linear(
        x, weight, bias,
        num_heads=num_heads, head_size=head_size, out_features=out_features,
        compute_dtype=jnp.float32)
    out_f = jax.block_until_ready(out_f)
    assert jnp.allclose(out_f, ref_f32 + bias, atol=1e-5, rtol=1e-5)

    print("KERNEL_OK")
</pallas_src>

<mosaic_0001>
module attributes {stable_mosaic.version = 11 : i64} {
  func.func @_probe(%arg0: i32, %arg1: memref<8x128xf32, #tpu.memory_space<vmem>>, %arg2: memref<8x128xf32, #tpu.memory_space<vmem>>) attributes {dimension_semantics = [#tpu.dimension_semantics<arbitrary>], iteration_bounds = array<i64: 1>, scalar_prefetch = 0 : i64, scratch_operands = 0 : i64, tpu.core_type = #tpu.core_type<tc>, window_params = [{pipeline_mode = #tpu.pipeline_mode<synchronous>, transform_indices = @transform_0, window_bounds = array<i64: 8, 128>}, {pipeline_mode = #tpu.pipeline_mode<synchronous>, transform_indices = @transform_1, window_bounds = array<i64: 8, 128>}]} {
    %c0 = arith.constant 0 : index
    %c0_0 = arith.constant 0 : index
    %0 = vector.load %arg1[%c0, %c0_0] : memref<8x128xf32, #tpu.memory_space<vmem>>, vector<8x128xf32>
    %c0_1 = arith.constant 0 : index
    %c0_2 = arith.constant 0 : index
    %1 = vector.load %arg2[%c0_1, %c0_2] : memref<8x128xf32, #tpu.memory_space<vmem>>, vector<8x128xf32>
    tpu.vector_store %arg2[%c0_1, %c0_2], %0 {strides = array<i32>} : memref<8x128xf32, #tpu.memory_space<vmem>>, vector<8x128xf32>,
    return
  }
  func.func @transform_0(%arg0: i32) -> (i32, i32) {
    %c0_i32 = arith.constant 0 : i32
    %c0_i32_0 = arith.constant 0 : i32
    %c0_i32_1 = arith.constant 0 : i32
    return %c0_i32, %c0_i32_0 : i32, i32
  }
  func.func @transform_1(%arg0: i32) -> (i32, i32) {
    %c0_i32 = arith.constant 0 : i32
    %c0_i32_0 = arith.constant 0 : i32
    %c0_i32_1 = arith.constant 0 : i32
    return %c0_i32, %c0_i32_0 : i32, i32
  }
}

module attributes {stable_mosaic.version = 11 : i64} {
  func.func @_wl_bias_kernel(%arg0: i32, %arg1: i32, %arg2: memref<16x256xbf16, #tpu.memory_space<vmem>>, %arg3: memref<1x256x256xbf16, #tpu.memory_space<vmem>>, %arg4: memref<1x256xf32, #tpu.memory_space<vmem>>, %arg5: memref<16x256xf32, #tpu.memory_space<vmem>>) attributes {dimension_semantics = [#tpu.dimension_semantics<parallel>, #tpu.dimension_semantics<parallel>], iteration_bounds = array<i64: 1, 1>, scalar_prefetch = 0 : i64, scratch_operands = 0 : i64, tpu.core_type = #tpu.core_type<tc>, window_params = [{transform_indices = @transform_0, window_bounds = array<i64: 16, 256>}, {transform_indices = @transform_1, window_bounds = array<i64: 1, 256, 256>}, {pipeline_mode = #tpu.pipeline_mode<synchronous>, transform_indices = @transform_2, window_bounds = array<i64: 1, 256>}, {transform_indices = @transform_3, window_bounds = array<i64: 16, 256>}]} {
    %c0 = arith.constant 0 : index
    %c0_0 = arith.constant 0 : index
    %0 = vector.load %arg2[%c0, %c0_0] : memref<16x256xbf16, #tpu.memory_space<vmem>>, vector<16x256xbf16>
    %c0_1 = arith.constant 0 : index
    %c0_2 = arith.constant 0 : index
    %c0_3 = arith.constant 0 : index
    %1 = vector.load %arg3[%c0_1, %c0_2, %c0_3] : memref<1x256x256xbf16, #tpu.memory_space<vmem>>, vector<1x256x256xbf16>
    %2 = vector.shape_cast %1 : vector<1x256x256xbf16> to vector<256x256xbf16>
    %cst = arith.constant dense<0.000000e+00> : vector<16x256xf32>
    %3 = tpu.matmul %0, %2, %cst {dimension_numbers = #tpu.dot_dimension_numbers<[1], [0], [0], [1], [0, 0, 1, 1], [], []>} : vector<16x256xbf16>, vector<256x256xbf16>, vector<16x256xf32> -> vector<16x256xf32>
    %c0_4 = arith.constant 0 : index
    %c0_5 = arith.constant 0 : index
    %4 = vector.load %arg4[%c0_4, %c0_5] : memref<1x256xf32, #tpu.memory_space<vmem>>, vector<1x256xf32>
    %5 = vector.broadcast %4 : vector<1x256xf32> to vector<16x256xf32>
    %6 = arith.addf %3, %5 : vector<16x256xf32>
    %c0_6 = arith.constant 0 : index
    %c0_7 = arith.constant 0 : index
    %7 = vector.load %arg5[%c0_6, %c0_7] : memref<16x256xf32, #tpu.memory_space<vmem>>, vector<16x256xf32>
    tpu.vector_store %arg5[%c0_6, %c0_7], %6 {strides = array<i32>} : memref<16x256xf32, #tpu.memory_space<vmem>>, vector<16x256xf32>,
    return
  }
  func.func @transform_0(%arg0: i32, %arg1: i32) -> (i32, i32) {
    %c0_i32 = arith.constant 0 : i32
    return %arg1, %arg0 : i32, i32
  }
  func.func @transform_1(%arg0: i32, %arg1: i32) -> (i32, i32, i32) {
    %c0_i32 = arith.constant 0 : i32
    %c0_i32_0 = arith.constant 0 : i32
    %c0_i32_1 = arith.constant 0 : i32
    return %arg0, %c0_i32, %c0_i32_0 : i32, i32, i32
  }
  func.func @transform_2(%arg0: i32, %arg1: i32) -> (i32, i32) {
    %c0_i32 = arith.constant 0 : i32
    %c0_i32_0 = arith.constant 0 : i32
    %c0_i32_1 = arith.constant 0 : i32
    return %c0_i32, %c0_i32_0 : i32, i32
  }
  func.func @transform_3(%arg0: i32, %arg1: i32) -> (i32, i32) {
    %c0_i32 = arith.constant 0 : i32
    return %arg1, %arg0 : i32, i32
  }
}

</mosaic_0001>

<bundles_post_ra>
// kernel: tpu_custom_call.1
= control target key start
LH: loop header
LB: loop body
LE: loop exit
PB: predicated region body
PF: predicated region fallthrough
CT: control target
= control target key end

     0   :  { %6 = vsyncpa [#allocation3], 0  ;;  %s114_s0 = inlined_call_operand.hbm [shape: f32[8,128], index: 0, kind: input, shape index: {}]   ;;  %s115_s1 = inlined_call_operand.hbm [shape: f32[8,128], index: 1, kind: output, shape index: {}]  }
   0x1   :  { %7 = vsyncpa [#allocation4], 0  ;;  %s13_s8 = sshll.u32 %s114_s0, 4  ;;  %s96_s9 = smov [#allocation2]   ;;  %s14_s8 = int_to_ptr.hbm [resolvable:$true] %s13_s8 }
   0x2   :  { %s15_s10 = sshll.u32 %s96_s9, 4  ;;  %s16_s10 = int_to_ptr.vmem [resolvable:$true] %s15_s10 }
   0x3   :  { %18 = dma.hbm_to_vmem [thread:$0]  %s14_s8, 128, %s16_s10, [#allocation3]  }
   0x4   :  { %92 = dma.done.wait [#allocation3], 128  }
   0x5   :  { %93 = vsyncadd [#allocation3], 4294967168  ;;  %s97_s11 = smov [#allocation5]   ;;  %s32_s15 = sshll.u32 %s115_s1, 4  ;;  %v23_v0 = vld [vmem:[#allocation2] sm:$0xff]  ;;  %s33_s15 = int_to_ptr.hbm [resolvable:$true] %s32_s15 }
   0x6   :  { %s30_s12 = sshll.u32 %s97_s11, 4  ;;  %24 = vst [vmem:[#allocation5] sm:$0xff] %v23_v0  ;;  %s31_s12 = int_to_ptr.vmem [resolvable:$true] %s30_s12 }
   0x7   :  { %35 = dma.vmem_to_hbm [thread:$0]  %s31_s12, 128, %s33_s15, [#allocation4]  }
   0x8   :  { %94 = dma.done.wait [#allocation4], 128  }
   0x9   :  { %95 = vsyncadd [#allocation4], 4294967168 }
   0xa   :  { %40 = vsyncpa [#allocation3], 1 }
   0xb   :  { %41 = vsyncpa [#allocation4], 1 }

// kernel: tpu_custom_call.1
= control target key start
LH: loop header
LB: loop body
LE: loop exit
PB: predicated region body
PF: predicated region fallthrough
CT: control target
= control target key end

     0   :  { %8 = vsyncpa [#allocation3], 0  ;;  %s670_s0 = inlined_call_operand.hbm [shape: bf16[16,256], index: 0, kind: input, shape index: {}]   ;;  %s671_s1 = inlined_call_operand.hbm [shape: bf16[1,256,256], index: 1, kind: input, shape index: {}]   ;;  %s672_s2 = inlined_call_operand.hbm [shape: f32[1,256], index: 2, kind: input, shape index: {}]   ;;  %s673_s3 = inlined_call_operand.hbm [shape: f32[16,256], index: 3, kind: output, shape index: {}]  }
   0x1   :  { %9 = vsyncpa [#allocation6], 0 }
   0x2   :  { %10 = vsyncpa [#allocation4], 0  ;;  %s28_s14 = sshll.u32 %s671_s1, 4  ;;  %s630_s15 = smov [#allocation5]   ;;  %s29_s14 = int_to_ptr.hbm [resolvable:$true] %s28_s14 }
   0x3   :  { %s30_s16 = sshll.u32 %s630_s15, 4  ;;  %s15_s19 = sshll.u32 %s670_s0, 4  ;;  %s31_s16 = int_to_ptr.vmem [resolvable:$true] %s30_s16  ;;  %s16_s19 = int_to_ptr.hbm [resolvable:$true] %s15_s19 }
   0x4   :  { %s631_s20 = smov 128   ;;  %s632_s21 = smov 8  }
   0x5   :  { %36 = dma.hbm_to_vmem [thread:$0]  %s29_s14, 4096, %s31_s16, [#allocation6], %s631_s20, %s631_s20, %s632_s21  }
   0x6   :  { %s633_s22 = smov [#allocation2]   ;;  %s42_s26 = sshll.u32 %s672_s2, 4  ;;  %s43_s26 = int_to_ptr.hbm [resolvable:$true] %s42_s26 }
   0x7   :  { %s17_s23 = sshll.u32 %s633_s22, 4  ;;  %s634_s1 = smov [#allocation7]   ;;  %s18_s23 = int_to_ptr.vmem [resolvable:$true] %s17_s23 }
   0x8   :  { %23 = dma.hbm_to_vmem [thread:$0]  %s16_s19, 256, %s18_s23, [#allocation3], %s631_s20, %s631_s20, %s632_s21  }
   0x9   :  { %s44_s27 = sshll.u32 %s634_s1, 4  ;;  %s45_s27 = int_to_ptr.vmem [resolvable:$true] %s44_s27 }
   0xa   :  { %47 = dma.hbm_to_vmem [thread:$0]  %s43_s26, 32, %s45_s27, [#allocation6]  }
   0xb   :  { %624 = dma.done.wait [#allocation3], 256  }
   0xc   :  { %625 = vsyncadd [#allocation3], 4294967040 }
   0xd   :  { %626 = dma.done.wait [#allocation6], 4128  }
   0xe   :  { %627 = vsyncadd [#allocation6], 4294963168  ;;  %v416_v0 = vld [vmem:[#allocation5 + $0x70] sm:$0xf]  ;;  %v503_v1 = vld [vmem:[#allocation5 + $0x74] sm:$0xf0] }
   0xf   :  { %v480_v2 = vld [vmem:[#allocation5 + $0xf0] sm:$0xf]  ;;  %v417_v3 = vor.u32 %v503_v1, %v416_v0  ;;  %v519_v4 = vld [vmem:[#allocation5 + $0xf4] sm:$0xf0]  ;;  %v502_v5 = vld [vmem:[#allocation5 + $0x74] sm:$0xf] }
  0x10   :  { %v418_v6 = vld [vmem:[#allocation5 + $0x78] sm:$0xf0]  ;;  %v481_v7 = vor.u32 %v519_v4, %v480_v2  ;;  %v518_v9 = vld [vmem:[#allocation5 + $0xf4] sm:$0xf]  ;;  %v408_v11 = vld [vmem:[#allocation5 + $0x60] sm:$0xf] }
  0x11   :  { %v421_v8 = vor.u32 %v502_v5, %v418_v6  ;;  %v482_v10 = vld [vmem:[#allocation5 + $0xf8] sm:$0xf0]  ;;  %270 = vmatpush.bf16.msra.mxu0 %v417_v3  ;;  %v501_v13 = vld [vmem:[#allocation5 + $0x64] sm:$0xf0]  ;;  %v472_v14 = vld [vmem:[#allocation5 + $0xe0] sm:$0xf] }
  0x12   :  { %v485_v12 = vor.u32 %v518_v9, %v482_v10  ;;  %v517_v15 = vld [vmem:[#allocation5 + $0xe4] sm:$0xf0]  ;;  %284 = vmatpush.bf16.msra.mxu1 %v481_v7  ;;  %v409_v16 = vor.u32 %v501_v13, %v408_v11  ;;  %v500_v18 = vld [vmem:[#allocation5 + $0x64] sm:$0xf]  ;;  %v410_v19 = vld [vmem:[#allocation5 + $0x68] sm:$0xf0] }
  0x13   :  { %298 = vmatpush.bf16.msra.mxu2 %v421_v8  ;;  %v473_v17 = vor.u32 %v517_v15, %v472_v14  ;;  %v516_v20 = vld [vmem:[#allocation5 + $0xe4] sm:$0xf]  ;;  %v413_v21 = vor.u32 %v500_v18, %v410_v19  ;;  %v474_v22 = vld [vmem:[#allocation5 + $0xe8] sm:$0xf0]  ;;  %v400_v23 = vld [vmem:[#allocation5 + $0x50] sm:$0xf] }
  0x14   :  { %312 = vmatpush.bf16.msra.mxu3 %v485_v12  ;;  %v499_v24 = vld [vmem:[#allocation5 + $0x54] sm:$0xf0]  ;;  %v477_v25 = vor.u32 %v516_v20, %v474_v22  ;;  %v464_v26 = vld [vmem:[#allocation5 + $0xd0] sm:$0xf]  ;;  %v498_v28 = vld [vmem:[#allocation5 + $0x54] sm:$0xf] }
  0x15   :  { %v515_v27 = vld [vmem:[#allocation5 + $0xd4] sm:$0xf0]  ;;  %271 = vmatpush.bf16.msra.mxu0 %v409_v16  ;;  %v401_v29 = vor.u32 %v499_v24, %v400_v23  ;;  %v402_v30 = vld [vmem:[#allocation5 + $0x58] sm:$0xf0]  ;;  %v514_v31 = vld [vmem:[#allocation5 + $0xd4] sm:$0xf] }
  0x16   :  { %v466_v32 = vld [vmem:[#allocation5 + $0xd8] sm:$0xf0]  ;;  %285 = vmatpush.bf16.msra.mxu1 %v473_v17  ;;  %v465_v33 = vor.u32 %v515_v27, %v464_v26  ;;  %v405_v34 = vor.u32 %v498_v28, %v402_v30  ;;  %v392_v35 = vld [vmem:[#allocation5 + $0x40] sm:$0xf]  ;;  %v497_v36 = vld [vmem:[#allocation5 + $0x44] sm:$0xf0] }
  0x17   :  { %299 = vmatpush.bf16.msra.mxu2 %v413_v21  ;;  %v456_v37 = vld [vmem:[#allocation5 + $0xc0] sm:$0xf]  ;;  %v469_v38 = vor.u32 %v514_v31, %v466_v32  ;;  %v513_v39 = vld [vmem:[#allocation5 + $0xc4] sm:$0xf0]  ;;  %v496_v40 = vld [vmem:[#allocation5 + $0x44] sm:$0xf]  ;;  %v393_v44 = vor.u32 %v497_v36, %v392_v35 }
  0x18   :  { %313 = vmatpush.bf16.msra.mxu3 %v477_v25  ;;  %v394_v41 = vld [vmem:[#allocation5 + $0x48] sm:$0xf0]  ;;  %v512_v42 = vld [vmem:[#allocation5 + $0xc4] sm:$0xf]  ;;  %v457_v45 = vor.u32 %v513_v39, %v456_v37  ;;  %v384_v47 = vld [vmem:[#allocation5 + $0x30] sm:$0xf] }
  0x19   :  { %v458_v43 = vld [vmem:[#allocation5 + $0xc8] sm:$0xf0]  ;;  %272 = vmatpush.bf16.msra.mxu0 %v401_v29  ;;  %v397_v46 = vor.u32 %v496_v40, %v394_v41  ;;  %v495_v48 = vld [vmem:[#allocation5 + $0x34] sm:$0xf0]  ;;  %v448_v49 = vld [vmem:[#allocation5 + $0xb0] sm:$0xf] }
  0x1a   :  { %286 = vmatpush.bf16.msra.mxu1 %v465_v33  ;;  %v461_v50 = vor.u32 %v512_v42, %v458_v43  ;;  %v511_v51 = vld [vmem:[#allocation5 + $0xb4] sm:$0xf0]  ;;  %v494_v52 = vld [vmem:[#allocation5 + $0x34] sm:$0xf]  ;;  %v386_v53 = vld [vmem:[#allocation5 + $0x38] sm:$0xf0]  ;;  %v385_v56 = vor.u32 %v495_v48, %v384_v47 }
  0x1b   :  { %300 = vmatpush.bf16.msra.mxu2 %v405_v34  ;;  %v510_v54 = vld [vmem:[#allocation5 + $0xb4] sm:$0xf]  ;;  %v450_v55 = vld [vmem:[#allocation5 + $0xb8] sm:$0xf0]  ;;  %v449_v57 = vor.u32 %v511_v51, %v448_v49  ;;  %v389_v58 = vor.u32 %v494_v52, %v386_v53  ;;  %v376_v59 = vld [vmem:[#allocation5 + $0x20] sm:$0xf] }
  0x1c   :  { %314 = vmatpush.bf16.msra.mxu3 %v469_v38  ;;  %v493_v60 = vld [vmem:[#allocation5 + $0x24] sm:$0xf0]  ;;  %v440_v61 = vld [vmem:[#allocation5 + $0xa0] sm:$0xf]  ;;  %v453_v62 = vor.u32 %v510_v54, %v450_v55  ;;  %v492_v0 = vld [vmem:[#allocation5 + $0x24] sm:$0xf] }
  0x1d   :  { %273 = vmatpush.bf16.msra.mxu0 %v393_v44  ;;  %v509_v63 = vld [vmem:[#allocation5 + $0xa4] sm:$0xf0]  ;;  %v378_v1 = vld [vmem:[#allocation5 + $0x28] sm:$0xf0]  ;;  %v508_v2 = vld [vmem:[#allocation5 + $0xa4] sm:$0xf]  ;;  %v377_v4 = vor.u32 %v493_v60, %v376_v59 }
  0x1e   :  { %287 = vmatpush.bf16.msra.mxu1 %v457_v45  ;;  %v442_v3 = vld [vmem:[#allocation5 + $0xa8] sm:$0xf0]  ;;  %v441_v5 = vor.u32 %v509_v63, %v440_v61  ;;  %v381_v6 = vor.u32 %v492_v0, %v378_v1  ;;  %v368_v7 = vld [vmem:[#allocation5 + $0x10] sm:$0xf]  ;;  %v491_v8 = vld [vmem:[#allocation5 + $0x14] sm:$0xf0] }
  0x1f   :  { %301 = vmatpush.bf16.msra.mxu2 %v397_v46  ;;  %v432_v9 = vld [vmem:[#allocation5 + $0x90] sm:$0xf]  ;;  %v445_v10 = vor.u32 %v508_v2, %v442_v3  ;;  %v507_v11 = vld [vmem:[#allocation5 + $0x94] sm:$0xf0]  ;;  %v490_v12 = vld [vmem:[#allocation5 + $0x14] sm:$0xf]  ;;  %v369_v16 = vor.u32 %v491_v8, %v368_v7 }
  0x20   :  { %315 = vmatpush.bf16.msra.mxu3 %v461_v50  ;;  %v370_v13 = vld [vmem:[#allocation5 + $0x18] sm:$0xf0]  ;;  %v506_v14 = vld [vmem:[#allocation5 + $0x94] sm:$0xf]  ;;  %v433_v17 = vor.u32 %v507_v11, %v432_v9  ;;  %v360_v19 = vld [vmem:[#allocation5] sm:$0xf] }
  0x21   :  { %274 = vmatpush.bf16.msra.mxu0 %v385_v56  ;;  %v434_v15 = vld [vmem:[#allocation5 + $0x98] sm:$0xf0]  ;;  %v373_v18 = vor.u32 %v490_v12, %v370_v13  ;;  %v489_v20 = vld [vmem:[#allocation5 + $0x4] sm:$0xf0]  ;;  %v424_v21 = vld [vmem:[#allocation5 + $0x80] sm:$0xf] }
  0x22   :  { %288 = vmatpush.bf16.msra.mxu1 %v449_v57  ;;  %v437_v22 = vor.u32 %v506_v14, %v434_v15  ;;  %v505_v23 = vld [vmem:[#allocation5 + $0x84] sm:$0xf0]  ;;  %v488_v24 = vld [vmem:[#allocation5 + $0x4] sm:$0xf]  ;;  %v362_v25 = vld [vmem:[#allocation5 + $0x8] sm:$0xf0]  ;;  %v361_v28 = vor.u32 %v489_v20, %v360_v19 }
  0x23   :  { %302 = vmatpush.bf16.msra.mxu2 %v389_v58  ;;  %v504_v26 = vld [vmem:[#allocation5 + $0x84] sm:$0xf]  ;;  %v426_v27 = vld [vmem:[#allocation5 + $0x88] sm:$0xf0]  ;;  %v352_v29 = vld [vmem:[#allocation2] sm:$0xf]  ;;  %v425_v31 = vor.u32 %v505_v23, %v424_v21  ;;  %v365_v32 = vor.u32 %v488_v24, %v362_v25 }
  0x24   :  { %316 = vmatpush.bf16.msra.mxu3 %v453_v62  ;;  %v487_v30 = vld [vmem:[#allocation2 + $0x4] sm:$0xf0]  ;;  %v486_v33 = vld [vmem:[#allocation2 + $0x4] sm:$0xf]  ;;  %v354_v34 = vld [vmem:[#allocation2 + $0x8] sm:$0xf0]  ;;  %v429_v35 = vor.u32 %v504_v26, %v426_v27 }
  0x25   :  { %275 = vmatpush.bf16.msra.mxu0 %v377_v4  ;;  %v353_v36 = vor.u32 %v487_v30, %v352_v29  ;;  %v357_v37 = vor.u32 %v486_v33, %v354_v34  ;;  %v94_v38 = vld [vmem:[#allocation7] sm:$0x3]  ;;  %s635_s0 = smov [#allocation8]   ;;  %s336_s30 = sshll.u32 %s673_s3, 4  ;;  %s337_s30 = int_to_ptr.hbm [resolvable:$true] %s336_s30 }
  0x26   :  { %289 = vmatpush.bf16.msra.mxu1 %v441_v5  ;;  %v96_v39 = vperm.slane %v94_v38, 0  ;;  %v97_v44 = vperm.slane %v94_v38, 1  ;;  %s334_s2 = sshll.u32 %s635_s0, 4  ;;  %s636_s4 = smov 256   ;;  %s335_s2 = int_to_ptr.vmem [resolvable:$true] %s334_s2 }
  0x27   :  { %303 = vmatpush.bf16.msra.mxu2 %v381_v6  ;;  %s637_s5 = smov 16  }
  0x28   :  { %317 = vmatpush.bf16.msra.mxu3 %v445_v10 }
  0x29   :  { %276 = vmatpush.bf16.msra.mxu0 %v369_v16 }
  0x2a   :  { %290 = vmatpush.bf16.msra.mxu1 %v433_v17 }
  0x2b   :  { %304 = vmatpush.bf16.msra.mxu2 %v373_v18 }
  0x2c   :  { %318 = vmatpush.bf16.msra.mxu3 %v437_v22 }
  0x2d   :  { %277 = vmatpush.bf16.msra.mxu0 %v361_v28 }
  0x2e   :  { %291 = vmatpush.bf16.msra.mxu1 %v425_v31 }
  0x2f   :  { %305 = vmatpush.bf16.msra.mxu2 %v365_v32 }
  0x30   :  { %319 = vmatpush.bf16.msra.mxu3 %v429_v35  ;;  %278 = vmatmul.bf16.vlgmr.msra.gmra.mxu0 %v353_v36 }
  0x31   :  { %292 = vmatmul.bf16.vlgmr.msra.gmra.mxu1 %v357_v37 }
  0x32   :  { %306 = vmatmul.bf16.vlgmr.msra.gmra.mxu2 %v353_v36 }
  0x33   :  { %320 = vmatmul.bf16.vlgmr.msra.gmra.mxu3 %v357_v37 }
  0xad   :  { %v279_v40 = vpop.f32.mrf.mxu0 }
  0xae   :  { %v280_v41 = vadd.f32 %v279_v40, %v96_v39  ;;  %v293_v42 = vpop.f32.mrf.mxu1 }
  0xb0   :  { %v294_v43 = vadd.f32 %v293_v42, %v280_v41 }
  0xb2   :  { %326 = vst [vmem:[#allocation8] sm:$0xff] %v294_v43 }
  0xb5   :  { %v307_v45 = vpop.f32.mrf.mxu2  ;;  %v281_v48 = vpop.f32.mrf.mxu0 }
  0xb6   :  { %v308_v46 = vadd.f32 %v307_v45, %v97_v44  ;;  %v321_v47 = vpop.f32.mrf.mxu3  ;;  %v282_v49 = vadd.f32 %v281_v48, %v96_v39  ;;  %v295_v51 = vpop.f32.mrf.mxu1 }
  0xb8   :  { %v322_v50 = vadd.f32 %v321_v47, %v308_v46  ;;  %v296_v52 = vadd.f32 %v295_v51, %v282_v49 }
  0xba   :  { %327 = vst [vmem:[#allocation8 + $0x8] sm:$0xff] %v322_v50 }
  0xbb   :  { %328 = vst [vmem:[#allocation8 + $0x10] sm:$0xff] %v296_v52 }
  0xbd   :  { %v309_v53 = vpop.f32.mrf.mxu2 }
  0xbe   :  { %v310_v54 = vadd.f32 %v309_v53, %v97_v44  ;;  %v323_v55 = vpop.f32.mrf.mxu3 }
  0xc0   :  { %v324_v56 = vadd.f32 %v323_v55, %v310_v54 }
  0xc2   :  { %329 = vst [vmem:[#allocation8 + $0x18] sm:$0xff] %v324_v56 }
  0xc3   :  { %342 = dma.vmem_to_hbm [thread:$0]  %s335_s2, 512, %s337_s30, [#allocation4], %s636_s4, %s636_s4, %s637_s5  }
  0xc4   :  { %628 = dma.done.wait [#allocation4], 512  }
  0xc5   :  { %629 = vsyncadd [#allocation4], 4294966784 }
  0xc6   :  { %347 = vsyncpa [#allocation3], 1 }
  0xc7   :  { %348 = vsyncpa [#allocation6], 1 }
  0xc8   :  { %349 = vsyncpa [#allocation4], 1 }

</bundles_post_ra>
